<compile_context>
chip_gen: v5e
topology: v5e:2x2
jax: 0.10.0
libtpu: 0.0.40
codegen_flags: <defaults>
</compile_context>

<pallas_src>
import jax
import jax.numpy as jnp
from jax.experimental import pallas as pl
from jax.experimental.pallas import tpu as pltpu

IN_FEATS = 20      # ih0: Linear(20, 50)
HIDDEN = 50        # LSTMCell(50, 50)
GW = 128           # per-gate / per-state lane-aligned block width
NGATES = 4
GATES_W = NGATES * GW   # 512
KPAD = 2 * GW           # fused-weight K dim padded to 2 x 128 ( [h | x] )


# ----------------------------------------------------------------------------
# Kernel
# ----------------------------------------------------------------------------
def _lstm_stack_kernel(state_ref, x_ref, w_ref, b_ref, out_ref):
    """state_ref: [B, 512] f32  packed [h0|c0|h1|c1]  (pad lanes zero)
       x_ref:     [B, 128] f32  padded input           (pad lanes zero)
       w_ref:     [2, 256, 512] bf16  fused K-padded weights (layer 0, 1)
       b_ref:     [2, 1, 512]   f32   fused gate-padded biases
       out_ref:   [B, 512] f32  packed [h0n|c0n|h1n|c1n], aliased to state_ref
    """

    def cell(xin_f32, c_prev, layer):
        # Single fused MXU matmul per cell, native bf16 operands, f32 acc.
        gates = jnp.dot(
            xin_f32.astype(jnp.bfloat16), w_ref[layer],
            preferred_element_type=jnp.float32,
        ) + b_ref[layer]                                   # [B, 512] f32
        # 128-lane-aligned gate slices (PyTorch gate order i, f, g, o).
        # All elementwise math stays f32 (v5e-friendly).
        i_g = jax.nn.sigmoid(gates[:, 0 * GW:1 * GW])
        f_g = jax.nn.sigmoid(gates[:, 1 * GW:2 * GW])
        g_g = jnp.tanh(gates[:, 2 * GW:3 * GW])
        o_g = jax.nn.sigmoid(gates[:, 3 * GW:4 * GW])
        # Padded lanes: gate pre-activations are exactly 0 -> g = 0 and
        # c_prev pad is 0 -> c_new pad = 0, h_new pad = 0.
        c_new = f_g * c_prev + i_g * g_g
        h_new = o_g * jnp.tanh(c_new)
        return h_new, c_new                                # [B, 128] each

    h0 = state_ref[:, 0 * GW:1 * GW]
    c0 = state_ref[:, 1 * GW:2 * GW]
    h1 = state_ref[:, 2 * GW:3 * GW]
    c1 = state_ref[:, 3 * GW:4 * GW]
    x = x_ref[...]

    # Layer 0: gates0 = [h0 | x] @ W0 + b0   (ih0 Linear folded into W0/b0)
    xin0 = jnp.concatenate([h0, x], axis=-1)               # two aligned blocks
    h0n, c0n = cell(xin0, c0, 0)

    # Layer 1: gates1 = [h1 | h0_new] @ W1 + b1  (ih1 Linear folded into W1/b1)
    xin1 = jnp.concatenate([h1, h0n], axis=-1)             # two aligned blocks
    h1n, c1n = cell(xin1, c1, 1)

    # Single lane-dense output slab (same layout as the aliased input slab).
    out_ref[:, 0 * GW:1 * GW] = h0n
    out_ref[:, 1 * GW:2 * GW] = c0n
    out_ref[:, 2 * GW:3 * GW] = h1n
    out_ref[:, 3 * GW:4 * GW] = c1n


# ----------------------------------------------------------------------------
# One-time parameter preparation (hoisted out of the hot path)
# ----------------------------------------------------------------------------
def prepare_params(params):
    """Fold Linears into gate weights, fuse x/h weights, pad gate columns and
    the K dimension to 128-aligned blocks, cast weights to bf16, and stack
    both layers.  Call once."""
    f32 = jnp.float32
    H = HIDDEN

    def pad_gate_cols(a):
        # a: [..., 4*H] (PyTorch gate order) -> [..., 512], gate k at col k*GW.
        out = jnp.zeros(a.shape[:-1] + (GATES_W,), a.dtype)
        for k in range(NGATES):
            out = out.at[..., k * GW:k * GW + H].set(a[..., k * H:(k + 1) * H])
        return out

    def fold_layer(w_lin, b_lin, wih, whh, bih, bhh):
        # gates = x_in @ (W_lin^T W_ih^T) + (b_lin W_ih^T + b_ih + b_hh)
        #         + h @ W_hh^T
        wx = w_lin.T.astype(f32) @ wih.T.astype(f32)            # [in, 4H]
        b = b_lin.astype(f32) @ wih.T.astype(f32) + bih + bhh   # [4H]
        wh = whh.T.astype(f32)                                  # [H, 4H]
        # K-padded fused weight: rows 0..H-1 <- Wh, rows 128..128+in-1 <- Wx.
        w = jnp.zeros((KPAD, GATES_W), f32)
        w = w.at[0:H, :].set(pad_gate_cols(wh))
        w = w.at[GW:GW + wx.shape[0], :].set(pad_gate_cols(wx))
        return (w.astype(jnp.bfloat16),                          # [256, 512]
                pad_gate_cols(b.reshape(1, 4 * H)))              # [1, 512] f32

    w0, b0 = fold_layer(params["ih0_w"], params["ih0_b"],
                        params["lstm0_wih"], params["lstm0_whh"],
                        params["lstm0_bih"], params["lstm0_bhh"])
    w1, b1 = fold_layer(params["ih1_w"], params["ih1_b"],
                        params["lstm1_wih"], params["lstm1_whh"],
                        params["lstm1_bih"], params["lstm1_bhh"])
    return {"w": jnp.stack([w0, w1]),      # [2, 256, 512] bf16
            "b": jnp.stack([b0, b1])}      # [2, 1, 512]   f32


# ----------------------------------------------------------------------------
# Packing helpers (lane-dense slabs) and wrappers
# ----------------------------------------------------------------------------
def pack_state(h0, c0, h1, c1):
    B = h0.shape[0]
    slab = jnp.zeros((B, GATES_W), jnp.float32)
    slab = slab.at[:, 0 * GW:0 * GW + HIDDEN].set(h0)
    slab = slab.at[:, 1 * GW:1 * GW + HIDDEN].set(c0)
    slab = slab.at[:, 2 * GW:2 * GW + HIDDEN].set(h1)
    slab = slab.at[:, 3 * GW:3 * GW + HIDDEN].set(c1)
    return slab


def pad_x(x):
    B = x.shape[0]
    return jnp.zeros((B, GW), jnp.float32).at[:, :x.shape[1]].set(x)


def _lstm_step_packed(state_slab, x_pad, prepared):
    """Core single-step call: packed state slab in -> packed state slab out
    (aliased).  Must be called from inside jit so the slab is an XLA
    intermediate (safe to alias)."""
    B = state_slab.shape[0]
    vmem = pl.BlockSpec(memory_space=pltpu.MemorySpace.VMEM)
    return pl.pallas_call(
        _lstm_stack_kernel,
        out_shape=jax.ShapeDtypeStruct((B, GATES_W), jnp.float32),
        in_specs=[vmem, vmem, vmem, vmem],
        out_specs=vmem,
        input_output_aliases={0: 0},        # state-in slab -> state-out slab
    )(state_slab, x_pad, prepared["w"], prepared["b"])


@jax.jit
def lstm_forward_packed(x, h0, c0, h1, c1, prepared):
    """Build lane-dense slabs and run the kernel; returns the packed
    [B, 512] state slab (layout [h0n|c0n|h1n|c1n])."""
    return _lstm_step_packed(pack_state(h0, c0, h1, c1), pad_x(x), prepared)


def lstm_forward(x, h0, c0, h1, c1, prepared):
    """Module-compatible API: returns (h0n, c0n, h1n, c1n) as [B, 50]."""
    slab = lstm_forward_packed(x, h0, c0, h1, c1, prepared)
    return tuple(slab[:, k * GW:k * GW + HIDDEN] for k in range(4))


# ----------------------------------------------------------------------------
# References & test harness
# ----------------------------------------------------------------------------
def _init_params(key):
    """Deterministic synthetic parameters (PyTorch layouts / init ranges)."""
    H = HIDDEN
    keys = jax.random.split(key, 12)

    def u(k, shape, fan_in):
        bound = 1.0 / jnp.sqrt(fan_in)
        return jax.random.uniform(k, shape, jnp.float32, -bound, bound)

    return {
        "ih0_w": u(keys[0], (H, IN_FEATS), IN_FEATS),
        "ih0_b": u(keys[1], (H,), IN_FEATS),
        "lstm0_wih": u(keys[2], (4 * H, H), H),
        "lstm0_whh": u(keys[3], (4 * H, H), H),
        "lstm0_bih": u(keys[4], (4 * H,), H),
        "lstm0_bhh": u(keys[5], (4 * H,), H),
        "ih1_w": u(keys[6], (H, H), H),
        "ih1_b": u(keys[7], (H,), H),
        "lstm1_wih": u(keys[8], (4 * H, H), H),
        "lstm1_whh": u(keys[9], (4 * H, H), H),
        "lstm1_bih": u(keys[10], (4 * H,), H),
        "lstm1_bhh": u(keys[11], (4 * H,), H),
    }


def _reference_f32(inp, h0, c0, h1, c1, p):
    """Exact PyTorch-semantics f32 reference (unfolded, unfused, unpadded)."""
    H = HIDDEN

    def cell(x, h, c, wih, whh, bih, bhh):
        g = x @ wih.T + bih + h @ whh.T + bhh
        i = jax.nn.sigmoid(g[:, 0:H])
        f = jax.nn.sigmoid(g[:, H:2 * H])
        gg = jnp.tanh(g[:, 2 * H:3 * H])
        o = jax.nn.sigmoid(g[:, 3 * H:4 * H])
        c_n = f * c + i * gg
        return o * jnp.tanh(c_n), c_n

    x0 = inp @ p["ih0_w"].T + p["ih0_b"]
    h0n, c0n = cell(x0, h0, c0, p["lstm0_wih"], p["lstm0_whh"],
                    p["lstm0_bih"], p["lstm0_bhh"])
    x1 = h0n @ p["ih1_w"].T + p["ih1_b"]
    h1n, c1n = cell(x1, h1, c1, p["lstm1_wih"], p["lstm1_whh"],
                    p["lstm1_bih"], p["lstm1_bhh"])
    return h0n, c0n, h1n, c1n


def _reference_prepared(inp, h0, c0, h1, c1, pp):
    """Plain-JAX mirror of the kernel math (folded, padded, bf16 MXU operands,
    f32 accumulation / elementwise) — tight mechanical check of the Pallas
    lowering itself."""
    slab = pack_state(h0, c0, h1, c1)
    xp = pad_x(inp)
    w, b = pp["w"], pp["b"]

    def cell(xin, c_prev, layer):
        g = jnp.dot(xin.astype(jnp.bfloat16), w[layer],
                    preferred_element_type=jnp.float32) + b[layer]
        i = jax.nn.sigmoid(g[:, 0 * GW:1 * GW])
        f = jax.nn.sigmoid(g[:, 1 * GW:2 * GW])
        gg = jnp.tanh(g[:, 2 * GW:3 * GW])
        o = jax.nn.sigmoid(g[:, 3 * GW:4 * GW])
        c_n = f * c_prev + i * gg
        return o * jnp.tanh(c_n), c_n

    h0p, c0p = slab[:, 0:GW], slab[:, GW:2 * GW]
    h1p, c1p = slab[:, 2 * GW:3 * GW], slab[:, 3 * GW:4 * GW]
    h0n, c0n = cell(jnp.concatenate([h0p, xp], -1), c0p, 0)
    h1n, c1n = cell(jnp.concatenate([h1p, h0n], -1), c1p, 1)
    return (h0n[:, :HIDDEN], c0n[:, :HIDDEN],
            h1n[:, :HIDDEN], c1n[:, :HIDDEN])


if __name__ == "__main__":
    B = 3  # batch, as implied by the h0/c0 shapes (3, 50) in the spec
    key = jax.random.PRNGKey(0)
    k_in, k_par, k_h0, k_c0, k_h1, k_c1 = jax.random.split(key, 6)

    inp = jax.random.normal(k_in, (B, IN_FEATS), jnp.float32)   # one step [3, 20]
    # Non-zero states so the recurrent (W_hh) path is actually exercised.
    h0 = jax.random.normal(k_h0, (B, HIDDEN), jnp.float32)
    c0 = jax.random.normal(k_c0, (B, HIDDEN), jnp.float32)
    h1 = jax.random.normal(k_h1, (B, HIDDEN), jnp.float32)
    c1 = jax.random.normal(k_c1, (B, HIDDEN), jnp.float32)

    params = _init_params(k_par)
    prepared = prepare_params(params)            # one-time parameter prep

    slab = lstm_forward_packed(inp, h0, c0, h1, c1, prepared)
    slab = jax.block_until_ready(slab)

    # Padded-lane invariant: the packed state slab can be fed straight back
    # into the next timestep (aliased recurrence) only if pad lanes stay ~0.
    for k in range(4):
        pad = slab[:, k * GW + HIDDEN:(k + 1) * GW]
        assert float(jnp.max(jnp.abs(pad))) < 1e-6, "padded lanes not zero"

    outs = tuple(slab[:, k * GW:k * GW + HIDDEN] for k in range(4))
    ref_mech = _reference_prepared(inp, h0, c0, h1, c1, prepared)
    ref_f32 = _reference_f32(inp, h0, c0, h1, c1, params)

    for o, rm, rf in zip(outs, ref_mech, ref_f32):
        assert o.shape == (B, HIDDEN) and o.dtype == jnp.float32
        # Mechanical check: kernel vs identical-math JAX reference (same
        # folded / padded / bf16 MXU operands, f32 accumulation).
        assert jnp.allclose(o, rm, atol=1e-4, rtol=1e-4), \
            "kernel vs fused-math reference mismatch"
        # Fidelity check: bounds the bf16 weight/activation quantization error
        # against the exact-f32 PyTorch-semantics module.
        assert jnp.allclose(o, rf, atol=5e-2, rtol=5e-2), \
            "kernel vs f32 module mismatch"

    print("KERNEL_OK")
</pallas_src>

<mosaic_0001>
module attributes {stable_mosaic.version = 11 : i64} {
  func.func @_lstm_stack_kernel(%arg0: memref<3x512xf32, #tpu.memory_space<vmem>>, %arg1: memref<3x128xf32, #tpu.memory_space<vmem>>, %arg2: memref<2x256x512xbf16, #tpu.memory_space<vmem>>, %arg3: memref<2x1x512xf32, #tpu.memory_space<vmem>>, %arg4: memref<3x512xf32, #tpu.memory_space<vmem>>) attributes {dimension_semantics = [], scalar_prefetch = 0 : i64, scratch_operands = 0 : i64, tpu.core_type = #tpu.core_type<tc>} {
    %c0 = arith.constant 0 : index
    %c0_0 = arith.constant 0 : index
    %0 = vector.load %arg0[%c0, %c0_0] : memref<3x512xf32, #tpu.memory_space<vmem>>, vector<3x128xf32>
    %c0_1 = arith.constant 0 : index
    %c128 = arith.constant 128 : index
    %1 = vector.load %arg0[%c0_1, %c128] : memref<3x512xf32, #tpu.memory_space<vmem>>, vector<3x128xf32>
    %c0_2 = arith.constant 0 : index
    %c256 = arith.constant 256 : index
    %2 = vector.load %arg0[%c0_2, %c256] : memref<3x512xf32, #tpu.memory_space<vmem>>, vector<3x128xf32>
    %c0_3 = arith.constant 0 : index
    %c384 = arith.constant 384 : index
    %3 = vector.load %arg0[%c0_3, %c384] : memref<3x512xf32, #tpu.memory_space<vmem>>, vector<3x128xf32>
    %c0_4 = arith.constant 0 : index
    %c0_5 = arith.constant 0 : index
    %4 = vector.load %arg1[%c0_4, %c0_5] : memref<3x128xf32, #tpu.memory_space<vmem>>, vector<3x128xf32>
    %5 = tpu.concatenate %0, %4 in 1 : vector<3x128xf32>, vector<3x128xf32> -> vector<3x256xf32>
    %6 = arith.truncf %5 : vector<3x256xf32> to vector<3x256xbf16>
    %c0_6 = arith.constant 0 : index
    %c0_7 = arith.constant 0 : index
    %c0_8 = arith.constant 0 : index
    %7 = vector.load %arg2[%c0_6, %c0_7, %c0_8] : memref<2x256x512xbf16, #tpu.memory_space<vmem>>, vector<1x256x512xbf16>
    %8 = vector.shape_cast %7 : vector<1x256x512xbf16> to vector<256x512xbf16>
    %cst = arith.constant dense<0.000000e+00> : vector<3x512xf32>
    %9 = tpu.matmul %6, %8, %cst {dimension_numbers = #tpu.dot_dimension_numbers<[1], [0], [0], [1], [0, 0, 1, 1], [], []>} : vector<3x256xbf16>, vector<256x512xbf16>, vector<3x512xf32> -> vector<3x512xf32>
    %c0_9 = arith.constant 0 : index
    %c0_10 = arith.constant 0 : index
    %c0_11 = arith.constant 0 : index
    %10 = vector.load %arg3[%c0_9, %c0_10, %c0_11] : memref<2x1x512xf32, #tpu.memory_space<vmem>>, vector<1x1x512xf32>
    %11 = vector.shape_cast %10 : vector<1x1x512xf32> to vector<1x512xf32>
    %12 = vector.broadcast %11 : vector<1x512xf32> to vector<3x512xf32>
    %13 = arith.addf %9, %12 : vector<3x512xf32>
    %14 = vector.extract_strided_slice %13 {offsets = [0, 0], sizes = [3, 128], strides = [1, 1]} : vector<3x512xf32> to vector<3x128xf32>
    %15 = arith.negf %14 : vector<3x128xf32>
    %16 = math.exp %15 : vector<3x128xf32>
    %cst_12 = arith.constant 1.000000e+00 : f32
    %17 = vector.broadcast %cst_12 : f32 to vector<3x128xf32>
    %18 = arith.addf %17, %16 : vector<3x128xf32>
    %19 = arith.divf %17, %18 : vector<3x128xf32>
    %20 = vector.extract_strided_slice %13 {offsets = [0, 128], sizes = [3, 128], strides = [1, 1]} : vector<3x512xf32> to vector<3x128xf32>
    %21 = arith.negf %20 : vector<3x128xf32>
    %22 = math.exp %21 : vector<3x128xf32>
    %cst_13 = arith.constant 1.000000e+00 : f32
    %23 = vector.broadcast %cst_13 : f32 to vector<3x128xf32>
    %24 = arith.addf %23, %22 : vector<3x128xf32>
    %25 = arith.divf %23, %24 : vector<3x128xf32>
    %26 = vector.extract_strided_slice %13 {offsets = [0, 256], sizes = [3, 128], strides = [1, 1]} : vector<3x512xf32> to vector<3x128xf32>
    %27 = math.tanh %26 : vector<3x128xf32>
    %28 = vector.extract_strided_slice %13 {offsets = [0, 384], sizes = [3, 128], strides = [1, 1]} : vector<3x512xf32> to vector<3x128xf32>
    %29 = arith.negf %28 : vector<3x128xf32>
    %30 = math.exp %29 : vector<3x128xf32>
    %cst_14 = arith.constant 1.000000e+00 : f32
    %31 = vector.broadcast %cst_14 : f32 to vector<3x128xf32>
    %32 = arith.addf %31, %30 : vector<3x128xf32>
    %33 = arith.divf %31, %32 : vector<3x128xf32>
    %34 = arith.mulf %25, %1 : vector<3x128xf32>
    %35 = arith.mulf %19, %27 : vector<3x128xf32>
    %36 = arith.addf %34, %35 : vector<3x128xf32>
    %37 = math.tanh %36 : vector<3x128xf32>
    %38 = arith.mulf %33, %37 : vector<3x128xf32>
    %39 = tpu.concatenate %2, %38 in 1 : vector<3x128xf32>, vector<3x128xf32> -> vector<3x256xf32>
    %40 = arith.truncf %39 : vector<3x256xf32> to vector<3x256xbf16>
    %c1 = arith.constant 1 : index
    %c0_15 = arith.constant 0 : index
    %c0_16 = arith.constant 0 : index
    %41 = vector.load %arg2[%c1, %c0_15, %c0_16] : memref<2x256x512xbf16, #tpu.memory_space<vmem>>, vector<1x256x512xbf16>
    %42 = vector.shape_cast %41 : vector<1x256x512xbf16> to vector<256x512xbf16>
    %cst_17 = arith.constant dense<0.000000e+00> : vector<3x512xf32>
    %43 = tpu.matmul %40, %42, %cst_17 {dimension_numbers = #tpu.dot_dimension_numbers<[1], [0], [0], [1], [0, 0, 1, 1], [], []>} : vector<3x256xbf16>, vector<256x512xbf16>, vector<3x512xf32> -> vector<3x512xf32>
    %c1_18 = arith.constant 1 : index
    %c0_19 = arith.constant 0 : index
    %c0_20 = arith.constant 0 : index
    %44 = vector.load %arg3[%c1_18, %c0_19, %c0_20] : memref<2x1x512xf32, #tpu.memory_space<vmem>>, vector<1x1x512xf32>
    %45 = vector.shape_cast %44 : vector<1x1x512xf32> to vector<1x512xf32>
    %46 = vector.broadcast %45 : vector<1x512xf32> to vector<3x512xf32>
    %47 = arith.addf %43, %46 : vector<3x512xf32>
    %48 = vector.extract_strided_slice %47 {offsets = [0, 0], sizes = [3, 128], strides = [1, 1]} : vector<3x512xf32> to vector<3x128xf32>
    %49 = arith.negf %48 : vector<3x128xf32>
    %50 = math.exp %49 : vector<3x128xf32>
    %cst_21 = arith.constant 1.000000e+00 : f32
    %51 = vector.broadcast %cst_21 : f32 to vector<3x128xf32>
    %52 = arith.addf %51, %50 : vector<3x128xf32>
    %53 = arith.divf %51, %52 : vector<3x128xf32>
    %54 = vector.extract_strided_slice %47 {offsets = [0, 128], sizes = [3, 128], strides = [1, 1]} : vector<3x512xf32> to vector<3x128xf32>
    %55 = arith.negf %54 : vector<3x128xf32>
    %56 = math.exp %55 : vector<3x128xf32>
    %cst_22 = arith.constant 1.000000e+00 : f32
    %57 = vector.broadcast %cst_22 : f32 to vector<3x128xf32>
    %58 = arith.addf %57, %56 : vector<3x128xf32>
    %59 = arith.divf %57, %58 : vector<3x128xf32>
    %60 = vector.extract_strided_slice %47 {offsets = [0, 256], sizes = [3, 128], strides = [1, 1]} : vector<3x512xf32> to vector<3x128xf32>
    %61 = math.tanh %60 : vector<3x128xf32>
    %62 = vector.extract_strided_slice %47 {offsets = [0, 384], sizes = [3, 128], strides = [1, 1]} : vector<3x512xf32> to vector<3x128xf32>
    %63 = arith.negf %62 : vector<3x128xf32>
    %64 = math.exp %63 : vector<3x128xf32>
    %cst_23 = arith.constant 1.000000e+00 : f32
    %65 = vector.broadcast %cst_23 : f32 to vector<3x128xf32>
    %66 = arith.addf %65, %64 : vector<3x128xf32>
    %67 = arith.divf %65, %66 : vector<3x128xf32>
    %68 = arith.mulf %59, %3 : vector<3x128xf32>
    %69 = arith.mulf %53, %61 : vector<3x128xf32>
    %70 = arith.addf %68, %69 : vector<3x128xf32>
    %71 = math.tanh %70 : vector<3x128xf32>
    %72 = arith.mulf %67, %71 : vector<3x128xf32>
    %c0_24 = arith.constant 0 : index
    %c0_25 = arith.constant 0 : index
    %73 = vector.load %arg4[%c0_24, %c0_25] : memref<3x512xf32, #tpu.memory_space<vmem>>, vector<3x128xf32>
    tpu.vector_store %arg4[%c0_24, %c0_25], %38 {strides = array<i32>} : memref<3x512xf32, #tpu.memory_space<vmem>>, vector<3x128xf32>,
    %c0_26 = arith.constant 0 : index
    %c128_27 = arith.constant 128 : index
    %74 = vector.load %arg4[%c0_26, %c128_27] : memref<3x512xf32, #tpu.memory_space<vmem>>, vector<3x128xf32>
    tpu.vector_store %arg4[%c0_26, %c128_27], %36 {strides = array<i32>} : memref<3x512xf32, #tpu.memory_space<vmem>>, vector<3x128xf32>,
    %c0_28 = arith.constant 0 : index
    %c256_29 = arith.constant 256 : index
    %75 = vector.load %arg4[%c0_28, %c256_29] : memref<3x512xf32, #tpu.memory_space<vmem>>, vector<3x128xf32>
    tpu.vector_store %arg4[%c0_28, %c256_29], %72 {strides = array<i32>} : memref<3x512xf32, #tpu.memory_space<vmem>>, vector<3x128xf32>,
    %c0_30 = arith.constant 0 : index
    %c384_31 = arith.constant 384 : index
    %76 = vector.load %arg4[%c0_30, %c384_31] : memref<3x512xf32, #tpu.memory_space<vmem>>, vector<3x128xf32>
    tpu.vector_store %arg4[%c0_30, %c384_31], %70 {strides = array<i32>} : memref<3x512xf32, #tpu.memory_space<vmem>>, vector<3x128xf32>,
    return
  }
}

</mosaic_0001>

<bundles_post_ra>
// kernel: lstm_forward_packed.1
= control target key start
LH: loop header
LB: loop body
LE: loop exit
PB: predicated region body
PF: predicated region fallthrough
CT: control target
= control target key end

     0   :  { %9 = vsyncpa [#allocation3], 0  ;;  %s2108_s0 = inlined_call_operand.hbm [shape: f32[3,512], index: 0, kind: input, shape index: {}, may-alias: {0,4}]   ;;  %s2109_s1 = inlined_call_operand.vmem [shape: f32[3,128], index: 1, kind: input, shape index: {}]   ;;  %s2110_s2 = inlined_call_operand.hbm [shape: bf16[2,256,512], index: 2, kind: input, shape index: {}]   ;;  %s2111_s3 = inlined_call_operand.vmem [shape: f32[2,1,512], index: 3, kind: input, shape index: {}]   ;;  %s2112_s4 = inlined_call_operand.hbm [shape: f32[3,512], index: 4, kind: output, shape index: {}, may-alias: {0,4}]  }
   0x1   :  { %10 = vsyncpa [#allocation6], 0 }
   0x2   :  { %11 = vsyncpa [#allocation4], 0  ;;  %s17_s17 = sshll.u32 %s2108_s0, 4  ;;  %s1965_s18 = smov [#allocation2]   ;;  %s18_s17 = int_to_ptr.hbm [resolvable:$true] %s17_s17 }
   0x3   :  { %s19_s19 = sshll.u32 %s1965_s18, 4  ;;  %s29_s22 = sshll.u32 %s2110_s2, 4  ;;  %s20_s19 = int_to_ptr.vmem [resolvable:$true] %s19_s19  ;;  %s30_s22 = int_to_ptr.hbm [resolvable:$true] %s29_s22 }
   0x4   :  { %22 = dma.hbm_to_vmem [thread:$0]  %s18_s17, 256, %s20_s19, [#allocation3]  }
   0x5   :  { %s1966_s23 = smov [#allocation5]   ;;  %s1967_s25 = smov 256  }
   0x6   :  { %s31_s24 = sshll.u32 %s1966_s23, 4  ;;  %s1968_s26 = smov 16   ;;  %s32_s24 = int_to_ptr.vmem [resolvable:$true] %s31_s24 }
   0x7   :  { %37 = dma.hbm_to_vmem [thread:$0]  %s30_s22, 16384, %s32_s24, [#allocation6], %s1967_s25, %s1967_s25, %s1968_s26  }
   0x8   :  { %1959 = dma.done.wait [#allocation3], 256  }
   0x9   :  { %1960 = vsyncadd [#allocation3], 4294967040 }
   0xa   :  { %1961 = dma.done.wait [#allocation6], 16384  }
   0xb   :  { %1962 = vsyncadd [#allocation6], 4294950912  ;;  %v1317_v0 = vld [vmem:[#allocation5 + $0xe0] sm:$0xf]  ;;  %v1752_v1 = vld [vmem:[#allocation5 + $0xec] sm:$0xf0] }
   0xc   :  { %v1750_v2 = vld [vmem:[#allocation5 + $0xe4] sm:$0xf]  ;;  %v1318_v3 = vor.u32 %v1752_v1, %v1317_v0  ;;  %v1319_v4 = vld [vmem:[#allocation5 + $0xf0] sm:$0xf0]  ;;  %v1445_v9 = vld [vmem:[#allocation5 + $0x1e0] sm:$0xf] }
   0xd   :  { %v1782_v5 = vld [vmem:[#allocation5 + $0x1e4] sm:$0xf]  ;;  %v1447_v6 = vld [vmem:[#allocation5 + $0x1f0] sm:$0xf0]  ;;  %v1322_v7 = vor.u32 %v1750_v2, %v1319_v4  ;;  %v1784_v10 = vld [vmem:[#allocation5 + $0x1ec] sm:$0xf0] }
   0xe   :  { %v1450_v8 = vor.u32 %v1782_v5, %v1447_v6  ;;  %v1301_v11 = vld [vmem:[#allocation5 + $0xc0] sm:$0xf]  ;;  %449 = vmatpush.bf16.msra.mxu0 %v1318_v3  ;;  %v1446_v12 = vor.u32 %v1784_v10, %v1445_v9  ;;  %v1748_v13 = vld [vmem:[#allocation5 + $0xcc] sm:$0xf0]  ;;  %v1746_v14 = vld [vmem:[#allocation5 + $0xc4] sm:$0xf] }
   0xf   :  { %v1303_v15 = vld [vmem:[#allocation5 + $0xd0] sm:$0xf0]  ;;  %475 = vmatpush.bf16.msra.mxu2 %v1322_v7  ;;  %v1302_v16 = vor.u32 %v1748_v13, %v1301_v11  ;;  %v1778_v18 = vld [vmem:[#allocation5 + $0x1c4] sm:$0xf]  ;;  %v1429_v20 = vld [vmem:[#allocation5 + $0x1c0] sm:$0xf] }
  0x10   :  { %488 = vmatpush.bf16.msra.mxu3 %v1450_v8  ;;  %v1306_v17 = vor.u32 %v1746_v14, %v1303_v15  ;;  %v1431_v19 = vld [vmem:[#allocation5 + $0x1d0] sm:$0xf0]  ;;  %462 = vmatpush.bf16.msra.mxu1 %v1446_v12  ;;  %v1780_v22 = vld [vmem:[#allocation5 + $0x1cc] sm:$0xf0]  ;;  %v1285_v23 = vld [vmem:[#allocation5 + $0xa0] sm:$0xf] }
  0x11   :  { %v1434_v21 = vor.u32 %v1778_v18, %v1431_v19  ;;  %v1744_v24 = vld [vmem:[#allocation5 + $0xac] sm:$0xf0]  ;;  %v1430_v25 = vor.u32 %v1780_v22, %v1429_v20  ;;  %v1742_v26 = vld [vmem:[#allocation5 + $0xa4] sm:$0xf]  ;;  %v1287_v27 = vld [vmem:[#allocation5 + $0xb0] sm:$0xf0] }
  0x12   :  { %v1774_v28 = vld [vmem:[#allocation5 + $0x1a4] sm:$0xf]  ;;  %450 = vmatpush.bf16.msra.mxu0 %v1302_v16  ;;  %v1286_v29 = vor.u32 %v1744_v24, %v1285_v23  ;;  %v1415_v30 = vld [vmem:[#allocation5 + $0x1b0] sm:$0xf0]  ;;  %v1413_v31 = vld [vmem:[#allocation5 + $0x1a0] sm:$0xf]  ;;  %v1290_v33 = vor.u32 %v1742_v26, %v1287_v27 }
  0x13   :  { %v1776_v32 = vld [vmem:[#allocation5 + $0x1ac] sm:$0xf0]  ;;  %476 = vmatpush.bf16.msra.mxu2 %v1306_v17  ;;  %v1418_v34 = vor.u32 %v1774_v28, %v1415_v30  ;;  %v1269_v35 = vld [vmem:[#allocation5 + $0x80] sm:$0xf]  ;;  %v1738_v37 = vld [vmem:[#allocation5 + $0x84] sm:$0xf] }
  0x14   :  { %489 = vmatpush.bf16.msra.mxu3 %v1434_v21  ;;  %v1740_v36 = vld [vmem:[#allocation5 + $0x8c] sm:$0xf0]  ;;  %463 = vmatpush.bf16.msra.mxu1 %v1430_v25  ;;  %v1414_v38 = vor.u32 %v1776_v32, %v1413_v31  ;;  %v1271_v39 = vld [vmem:[#allocation5 + $0x90] sm:$0xf0]  ;;  %v1770_v40 = vld [vmem:[#allocation5 + $0x184] sm:$0xf] }
  0x15   :  { %v1399_v41 = vld [vmem:[#allocation5 + $0x190] sm:$0xf0]  ;;  %v1397_v42 = vld [vmem:[#allocation5 + $0x180] sm:$0xf]  ;;  %v1772_v43 = vld [vmem:[#allocation5 + $0x18c] sm:$0xf0]  ;;  %v1270_v44 = vor.u32 %v1740_v36, %v1269_v35  ;;  %v1274_v45 = vor.u32 %v1738_v37, %v1271_v39 }
  0x16   :  { %451 = vmatpush.bf16.msra.mxu0 %v1286_v29  ;;  %v1402_v46 = vor.u32 %v1770_v40, %v1399_v41  ;;  %v1253_v47 = vld [vmem:[#allocation5 + $0x60] sm:$0xf]  ;;  %v1736_v48 = vld [vmem:[#allocation5 + $0x6c] sm:$0xf0]  ;;  %v1734_v49 = vld [vmem:[#allocation5 + $0x64] sm:$0xf]  ;;  %v1398_v50 = vor.u32 %v1772_v43, %v1397_v42 }
  0x17   :  { %477 = vmatpush.bf16.msra.mxu2 %v1290_v33  ;;  %v1255_v51 = vld [vmem:[#allocation5 + $0x70] sm:$0xf0]  ;;  %v1766_v52 = vld [vmem:[#allocation5 + $0x164] sm:$0xf]  ;;  %v1381_v54 = vld [vmem:[#allocation5 + $0x160] sm:$0xf]  ;;  %v1254_v56 = vor.u32 %v1736_v48, %v1253_v47 }
  0x18   :  { %490 = vmatpush.bf16.msra.mxu3 %v1418_v34  ;;  %464 = vmatpush.bf16.msra.mxu1 %v1414_v38  ;;  %v1383_v53 = vld [vmem:[#allocation5 + $0x170] sm:$0xf0]  ;;  %v1768_v55 = vld [vmem:[#allocation5 + $0x16c] sm:$0xf0]  ;;  %v1258_v57 = vor.u32 %v1734_v49, %v1255_v51  ;;  %v1237_v59 = vld [vmem:[#allocation5 + $0x40] sm:$0xf] }
  0x19   :  { %v1386_v58 = vor.u32 %v1766_v52, %v1383_v53  ;;  %v1732_v60 = vld [vmem:[#allocation5 + $0x4c] sm:$0xf0]  ;;  %v1730_v61 = vld [vmem:[#allocation5 + $0x44] sm:$0xf]  ;;  %v1382_v62 = vor.u32 %v1768_v55, %v1381_v54  ;;  %v1239_v63 = vld [vmem:[#allocation5 + $0x50] sm:$0xf0] }
  0x1a   :  { %452 = vmatpush.bf16.msra.mxu0 %v1270_v44  ;;  %v1762_v0 = vld [vmem:[#allocation5 + $0x144] sm:$0xf]  ;;  %v1367_v1 = vld [vmem:[#allocation5 + $0x150] sm:$0xf0]  ;;  %v1365_v2 = vld [vmem:[#allocation5 + $0x140] sm:$0xf]  ;;  %v1238_v4 = vor.u32 %v1732_v60, %v1237_v59  ;;  %v1242_v5 = vor.u32 %v1730_v61, %v1239_v63 }
  0x1b   :  { %478 = vmatpush.bf16.msra.mxu2 %v1274_v45  ;;  %v1764_v3 = vld [vmem:[#allocation5 + $0x14c] sm:$0xf0]  ;;  %v1370_v6 = vor.u32 %v1762_v0, %v1367_v1  ;;  %v1221_v7 = vld [vmem:[#allocation5 + $0x20] sm:$0xf]  ;;  %v1726_v9 = vld [vmem:[#allocation5 + $0x24] sm:$0xf] }
  0x1c   :  { %491 = vmatpush.bf16.msra.mxu3 %v1402_v46  ;;  %465 = vmatpush.bf16.msra.mxu1 %v1398_v50  ;;  %v1728_v8 = vld [vmem:[#allocation5 + $0x2c] sm:$0xf0]  ;;  %v1366_v10 = vor.u32 %v1764_v3, %v1365_v2  ;;  %v1223_v11 = vld [vmem:[#allocation5 + $0x30] sm:$0xf0]  ;;  %v1758_v12 = vld [vmem:[#allocation5 + $0x124] sm:$0xf] }
  0x1d   :  { %v1351_v13 = vld [vmem:[#allocation5 + $0x130] sm:$0xf0]  ;;  %v1349_v14 = vld [vmem:[#allocation5 + $0x120] sm:$0xf]  ;;  %v1760_v15 = vld [vmem:[#allocation5 + $0x12c] sm:$0xf0]  ;;  %v1222_v16 = vor.u32 %v1728_v8, %v1221_v7  ;;  %v1226_v19 = vor.u32 %v1726_v9, %v1223_v11 }
  0x1e   :  { %453 = vmatpush.bf16.msra.mxu0 %v1254_v56  ;;  %v1205_v17 = vld [vmem:[#allocation5] sm:$0xf]  ;;  %v1724_v18 = vld [vmem:[#allocation5 + $0xc] sm:$0xf0]  ;;  %v1354_v20 = vor.u32 %v1758_v12, %v1351_v13  ;;  %v1722_v21 = vld [vmem:[#allocation5 + $0x4] sm:$0xf]  ;;  %v1350_v24 = vor.u32 %v1760_v15, %v1349_v14 }
  0x1f   :  { %479 = vmatpush.bf16.msra.mxu2 %v1258_v57  ;;  %v1207_v22 = vld [vmem:[#allocation5 + $0x10] sm:$0xf0]  ;;  %v1754_v23 = vld [vmem:[#allocation5 + $0x104] sm:$0xf]  ;;  %v1325_v26 = vld [vmem:[#allocation5 + $0xe8] sm:$0xf]  ;;  %v1206_v31 = vor.u32 %v1724_v18, %v1205_v17 }
  0x20   :  { %492 = vmatpush.bf16.msra.mxu3 %v1386_v58  ;;  %466 = vmatpush.bf16.msra.mxu1 %v1382_v62  ;;  %v1335_v25 = vld [vmem:[#allocation5 + $0x110] sm:$0xf0]  ;;  %v1753_v27 = vld [vmem:[#allocation5 + $0xf4] sm:$0xf0]  ;;  %v1751_v28 = vld [vmem:[#allocation5 + $0xec] sm:$0xf]  ;;  %v1210_v35 = vor.u32 %v1722_v21, %v1207_v22 }
  0x21   :  { %v1327_v29 = vld [vmem:[#allocation5 + $0xf8] sm:$0xf0]  ;;  %v1783_v30 = vld [vmem:[#allocation5 + $0x1ec] sm:$0xf]  ;;  %v1333_v33 = vld [vmem:[#allocation5 + $0x100] sm:$0xf]  ;;  %v1338_v36 = vor.u32 %v1754_v23, %v1335_v25  ;;  %v1326_v40 = vor.u32 %v1753_v27, %v1325_v26 }
  0x22   :  { %454 = vmatpush.bf16.msra.mxu0 %v1238_v4  ;;  %v1455_v32 = vld [vmem:[#allocation5 + $0x1f8] sm:$0xf0]  ;;  %v1756_v34 = vld [vmem:[#allocation5 + $0x10c] sm:$0xf0]  ;;  %v1453_v38 = vld [vmem:[#allocation5 + $0x1e8] sm:$0xf]  ;;  %v1330_v41 = vor.u32 %v1751_v28, %v1327_v29 }
  0x23   :  { %480 = vmatpush.bf16.msra.mxu2 %v1242_v5  ;;  %v48_v37 = vld [vmem:[#allocation2] sm:$0x7]  ;;  %v1785_v39 = vld [vmem:[#allocation5 + $0x1f4] sm:$0xf0]  ;;  %v1309_v43 = vld [vmem:[#allocation5 + $0xc8] sm:$0xf]  ;;  %v1458_v44 = vor.u32 %v1783_v30, %v1455_v32  ;;  %v1334_v45 = vor.u32 %v1756_v34, %v1333_v33 }
  0x24   :  { %493 = vmatpush.bf16.msra.mxu3 %v1370_v6  ;;  %467 = vmatpush.bf16.msra.mxu1 %v1366_v10  ;;  %v52_v42 = vld [vmem:[%s2109_s1] sm:$0x7]  ;;  %v1749_v46 = vld [vmem:[#allocation5 + $0xd4] sm:$0xf0]  ;;  %v1747_v47 = vld [vmem:[#allocation5 + $0xcc] sm:$0xf]  ;;  %v2004_v49 = vpack.c.bf16 %v48_v37, %v48_v37  ;;  %v1454_v50 = vor.u32 %v1785_v39, %v1453_v38 }
  0x25   :  { %v1311_v48 = vld [vmem:[#allocation5 + $0xd8] sm:$0xf0]  ;;  %v1779_v51 = vld [vmem:[#allocation5 + $0x1cc] sm:$0xf]  ;;  %v2006_v53 = vpack.c.bf16 %v52_v42, %v52_v42  ;;  %v1437_v54 = vld [vmem:[#allocation5 + $0x1c8] sm:$0xf]  ;;  %v1310_v56 = vor.u32 %v1749_v46, %v1309_v43 }
  0x26   :  { %455 = vmatpush.bf16.msra.mxu0 %v1222_v16  ;;  %v1439_v52 = vld [vmem:[#allocation5 + $0x1d8] sm:$0xf0]  ;;  %v1781_v55 = vld [vmem:[#allocation5 + $0x1d4] sm:$0xf0]  ;;  %v1314_v57 = vor.u32 %v1747_v47, %v1311_v48  ;;  %v1293_v58 = vld [vmem:[#allocation5 + $0xa8] sm:$0xf] }
  0x27   :  { %481 = vmatpush.bf16.msra.mxu2 %v1226_v19  ;;  %v1442_v59 = vor.u32 %v1779_v51, %v1439_v52  ;;  %v1745_v60 = vld [vmem:[#allocation5 + $0xb4] sm:$0xf0]  ;;  %v1743_v61 = vld [vmem:[#allocation5 + $0xac] sm:$0xf]  ;;  %v1295_v62 = vld [vmem:[#allocation5 + $0xb8] sm:$0xf0]  ;;  %v1438_v63 = vor.u32 %v1781_v55, %v1437_v54 }
  0x28   :  { %494 = vmatpush.bf16.msra.mxu3 %v1354_v20  ;;  %468 = vmatpush.bf16.msra.mxu1 %v1350_v24  ;;  %v1775_v0 = vld [vmem:[#allocation5 + $0x1ac] sm:$0xf]  ;;  %v1423_v1 = vld [vmem:[#allocation5 + $0x1b8] sm:$0xf0]  ;;  %v1421_v2 = vld [vmem:[#allocation5 + $0x1a8] sm:$0xf]  ;;  %v1294_v4 = vor.u32 %v1745_v60, %v1293_v58  ;;  %v1298_v5 = vor.u32 %v1743_v61, %v1295_v62 }
  0x29   :  { %v1777_v3 = vld [vmem:[#allocation5 + $0x1b4] sm:$0xf0]  ;;  %v1277_v6 = vld [vmem:[#allocation5 + $0x88] sm:$0xf]  ;;  %v1426_v7 = vor.u32 %v1775_v0, %v1423_v1  ;;  %v1739_v9 = vld [vmem:[#allocation5 + $0x8c] sm:$0xf] }
  0x2a   :  { %456 = vmatpush.bf16.msra.mxu0 %v1206_v31  ;;  %v1741_v8 = vld [vmem:[#allocation5 + $0x94] sm:$0xf0]  ;;  %v1279_v10 = vld [vmem:[#allocation5 + $0x98] sm:$0xf0]  ;;  %v1422_v11 = vor.u32 %v1777_v3, %v1421_v2  ;;  %v1771_v12 = vld [vmem:[#allocation5 + $0x18c] sm:$0xf] }
  0x2b   :  { %482 = vmatpush.bf16.msra.mxu2 %v1210_v35  ;;  %v1407_v13 = vld [vmem:[#allocation5 + $0x198] sm:$0xf0]  ;;  %v1405_v14 = vld [vmem:[#allocation5 + $0x188] sm:$0xf]  ;;  %v1773_v15 = vld [vmem:[#allocation5 + $0x194] sm:$0xf0]  ;;  %v1278_v16 = vor.u32 %v1741_v8, %v1277_v6  ;;  %v1282_v17 = vor.u32 %v1739_v9, %v1279_v10 }
  0x2c   :  { %495 = vmatpush.bf16.msra.mxu3 %v1338_v36  ;;  %469 = vmatpush.bf16.msra.mxu1 %v1334_v45  ;;  %v1261_v18 = vld [vmem:[#allocation5 + $0x68] sm:$0xf]  ;;  %v1410_v19 = vor.u32 %v1771_v12, %v1407_v13  ;;  %v1737_v20 = vld [vmem:[#allocation5 + $0x74] sm:$0xf0]  ;;  %v1735_v21 = vld [vmem:[#allocation5 + $0x6c] sm:$0xf]  ;;  %v1406_v23 = vor.u32 %v1773_v15, %v1405_v14 }
  0x2d   :  { %457 = vmatmul.bf16.vlgmr.msra.gmra.mxu0 %v2004_v49  ;;  %v1263_v22 = vld [vmem:[#allocation5 + $0x78] sm:$0xf0]  ;;  %v1767_v24 = vld [vmem:[#allocation5 + $0x16c] sm:$0xf]  ;;  %v1389_v26 = vld [vmem:[#allocation5 + $0x168] sm:$0xf]  ;;  %v1262_v28 = vor.u32 %v1737_v20, %v1261_v18 }
  0x2e   :  { %501 = vmatpush.bf16.msrb.mxu0 %v1326_v40  ;;  %483 = vmatmul.bf16.vlgmr.msra.gmra.mxu2 %v2004_v49  ;;  %v1391_v25 = vld [vmem:[#allocation5 + $0x178] sm:$0xf0]  ;;  %v1769_v27 = vld [vmem:[#allocation5 + $0x174] sm:$0xf0]  ;;  %v1266_v29 = vor.u32 %v1735_v21, %v1263_v22  ;;  %v1245_v30 = vld [vmem:[#allocation5 + $0x48] sm:$0xf] }
  0x2f   :  { %527 = vmatpush.bf16.msrb.mxu2 %v1330_v41  ;;  %496 = vmatmul.bf16.vlgmr.msra.gmra.mxu3 %v2006_v53  ;;  %v1394_v31 = vor.u32 %v1767_v24, %v1391_v25  ;;  %v1733_v32 = vld [vmem:[#allocation5 + $0x54] sm:$0xf0]  ;;  %v1731_v33 = vld [vmem:[#allocation5 + $0x4c] sm:$0xf]  ;;  %v1247_v34 = vld [vmem:[#allocation5 + $0x58] sm:$0xf0]  ;;  %v1390_v35 = vor.u32 %v1769_v27, %v1389_v26 }
  0x30   :  { %540 = vmatpush.bf16.msrb.mxu3 %v1458_v44  ;;  %514 = vmatpush.bf16.msrb.mxu1 %v1454_v50  ;;  %v1763_v36 = vld [vmem:[#allocation5 + $0x14c] sm:$0xf]  ;;  %v1375_v37 = vld [vmem:[#allocation5 + $0x158] sm:$0xf0]  ;;  %v1373_v38 = vld [vmem:[#allocation5 + $0x148] sm:$0xf]  ;;  %v1246_v40 = vor.u32 %v1733_v32, %v1245_v30  ;;  %v1250_v41 = vor.u32 %v1731_v33, %v1247_v34 }
  0x31   :  { %470 = vmatmul.bf16.vlgmr.msra.gmra.mxu1 %v2006_v53  ;;  %v1765_v39 = vld [vmem:[#allocation5 + $0x154] sm:$0xf0]  ;;  %v1229_v42 = vld [vmem:[#allocation5 + $0x28] sm:$0xf]  ;;  %v1378_v43 = vor.u32 %v1763_v36, %v1375_v37  ;;  %v1727_v45 = vld [vmem:[#allocation5 + $0x2c] sm:$0xf] }
  0x32   :  { %502 = vmatpush.bf16.msrb.mxu0 %v1310_v56  ;;  %v1729_v44 = vld [vmem:[#allocation5 + $0x34] sm:$0xf0]  ;;  %v1231_v46 = vld [vmem:[#allocation5 + $0x38] sm:$0xf0]  ;;  %v1374_v47 = vor.u32 %v1765_v39, %v1373_v38  ;;  %v1759_v48 = vld [vmem:[#allocation5 + $0x12c] sm:$0xf] }
  0x33   :  { %528 = vmatpush.bf16.msrb.mxu2 %v1314_v57  ;;  %v1359_v50 = vld [vmem:[#allocation5 + $0x138] sm:$0xf0]  ;;  %v1357_v51 = vld [vmem:[#allocation5 + $0x128] sm:$0xf]  ;;  %v1761_v52 = vld [vmem:[#allocation5 + $0x134] sm:$0xf0]  ;;  %v1230_v54 = vor.u32 %v1729_v44, %v1229_v42  ;;  %v1234_v55 = vor.u32 %v1727_v45, %v1231_v46 }
  0x34   :  { %541 = vmatpush.bf16.msrb.mxu3 %v1442_v59  ;;  %515 = vmatpush.bf16.msrb.mxu1 %v1438_v63  ;;  %v1213_v56 = vld [vmem:[#allocation5 + $0x8] sm:$0xf]  ;;  %v1362_v57 = vor.u32 %v1759_v48, %v1359_v50  ;;  %v1725_v58 = vld [vmem:[#allocation5 + $0x14] sm:$0xf0]  ;;  %v1723_v59 = vld [vmem:[#allocation5 + $0xc] sm:$0xf]  ;;  %v1358_v61 = vor.u32 %v1761_v52, %v1357_v51 }
  0x35   :  { %v1215_v60 = vld [vmem:[#allocation5 + $0x18] sm:$0xf0]  ;;  %v1755_v62 = vld [vmem:[#allocation5 + $0x10c] sm:$0xf]  ;;  %v1341_v0 = vld [vmem:[#allocation5 + $0x108] sm:$0xf]  ;;  %v1214_v2 = vor.u32 %v1725_v58, %v1213_v56 }
  0x36   :  { %503 = vmatpush.bf16.msrb.mxu0 %v1294_v4  ;;  %v1343_v63 = vld [vmem:[#allocation5 + $0x118] sm:$0xf0]  ;;  %v1757_v1 = vld [vmem:[#allocation5 + $0x114] sm:$0xf0]  ;;  %v1218_v3 = vor.u32 %v1723_v59, %v1215_v60  ;;  %v1814_v6 = vld [vmem:[#allocation5 + $0x2e4] sm:$0xf] }
  0x37   :  { %529 = vmatpush.bf16.msrb.mxu2 %v1298_v5  ;;  %v1346_v4 = vor.u32 %v1755_v62, %v1343_v63  ;;  %v1342_v5 = vor.u32 %v1757_v1, %v1341_v0  ;;  %v1810_v9 = vld [vmem:[#allocation5 + $0x2c4] sm:$0xf]  ;;  %v1563_v10 = vld [vmem:[#allocation5 + $0x2d0] sm:$0xf0]  ;;  %v1577_v12 = vld [vmem:[#allocation5 + $0x2e0] sm:$0xf] }
  0x38   :  { %542 = vmatpush.bf16.msrb.mxu3 %v1426_v7  ;;  %516 = vmatpush.bf16.msrb.mxu1 %v1422_v11  ;;  %v1579_v7 = vld [vmem:[#allocation5 + $0x2f0] sm:$0xf0]  ;;  %v1566_v11 = vor.u32 %v1810_v9, %v1563_v10  ;;  %v1816_v13 = vld [vmem:[#allocation5 + $0x2ec] sm:$0xf0]  ;;  %v1806_v14 = vld [vmem:[#allocation5 + $0x2a4] sm:$0xf] }
  0x39   :  { %v1582_v8 = vor.u32 %v1814_v6, %v1579_v7  ;;  %v1578_v15 = vor.u32 %v1816_v13, %v1577_v12  ;;  %v1705_v18 = vld [vmem:[#allocation5 + $0x3e0] sm:$0xf]  ;;  %v1707_v21 = vld [vmem:[#allocation5 + $0x3f0] sm:$0xf0]  ;;  %v1812_v24 = vld [vmem:[#allocation5 + $0x2cc] sm:$0xf0] }
  0x3a   :  { %504 = vmatpush.bf16.msrb.mxu0 %v1278_v16  ;;  %v1547_v16 = vld [vmem:[#allocation5 + $0x2b0] sm:$0xf0]  ;;  %v1802_v25 = vld [vmem:[#allocation5 + $0x284] sm:$0xf]  ;;  %v1689_v30 = vld [vmem:[#allocation5 + $0x3c0] sm:$0xf] }
  0x3b   :  { %530 = vmatpush.bf16.msrb.mxu2 %v1282_v17  ;;  %v1550_v17 = vor.u32 %v1806_v14, %v1547_v16  ;;  %v1842_v32 = vld [vmem:[#allocation5 + $0x3c4] sm:$0xf]  ;;  %v1691_v34 = vld [vmem:[#allocation5 + $0x3d0] sm:$0xf0]  ;;  %v1545_v36 = vld [vmem:[#allocation5 + $0x2a0] sm:$0xf] }
  0x3c   :  { %543 = vmatpush.bf16.msrb.mxu3 %v1410_v19  ;;  %517 = vmatpush.bf16.msrb.mxu1 %v1406_v23  ;;  %v1846_v19 = vld [vmem:[#allocation5 + $0x3e4] sm:$0xf]  ;;  %v1561_v23 = vld [vmem:[#allocation5 + $0x2c0] sm:$0xf]  ;;  %v1808_v37 = vld [vmem:[#allocation5 + $0x2ac] sm:$0xf0] }
  0x3d   :  { %v1710_v22 = vor.u32 %v1846_v19, %v1707_v21  ;;  %v1562_v27 = vor.u32 %v1812_v24, %v1561_v23  ;;  %v1798_v38 = vld [vmem:[#allocation5 + $0x264] sm:$0xf]  ;;  %v1673_v44 = vld [vmem:[#allocation5 + $0x3a0] sm:$0xf]  ;;  %v1840_v45 = vld [vmem:[#allocation5 + $0x3ac] sm:$0xf0] }
  0x3e   :  { %505 = vmatpush.bf16.msrb.mxu0 %v1262_v28  ;;  %v1531_v28 = vld [vmem:[#allocation5 + $0x290] sm:$0xf0]  ;;  %v1838_v46 = vld [vmem:[#allocation5 + $0x3a4] sm:$0xf]  ;;  %v1674_v50 = vor.u32 %v1840_v45, %v1673_v44  ;;  %v1804_v56 = vld [vmem:[#allocation5 + $0x28c] sm:$0xf0] }
  0x3f   :  { %531 = vmatpush.bf16.msrb.mxu2 %v1266_v29  ;;  %v1534_v29 = vor.u32 %v1802_v25, %v1531_v28  ;;  %v1675_v51 = vld [vmem:[#allocation5 + $0x3b0] sm:$0xf0]  ;;  %v1657_v63 = vld [vmem:[#allocation5 + $0x380] sm:$0xf]  ;;  %v1836_v0 = vld [vmem:[#allocation5 + $0x38c] sm:$0xf0] }
  0x40   :  { %544 = vmatpush.bf16.msrb.mxu3 %v1394_v31  ;;  %518 = vmatpush.bf16.msrb.mxu1 %v1390_v35  ;;  %v1844_v31 = vld [vmem:[#allocation5 + $0x3cc] sm:$0xf0]  ;;  %v1694_v35 = vor.u32 %v1842_v32, %v1691_v34  ;;  %v1499_v59 = vld [vmem:[#allocation5 + $0x250] sm:$0xf0]  ;;  %v1513_v7 = vld [vmem:[#allocation5 + $0x260] sm:$0xf] }
  0x41   :  { %v1690_v33 = vor.u32 %v1844_v31, %v1689_v30  ;;  %v1790_v9 = vld [vmem:[#allocation5 + $0x224] sm:$0xf]  ;;  %v1483_v13 = vld [vmem:[#allocation5 + $0x230] sm:$0xf0]  ;;  %v1832_v16 = vld [vmem:[#allocation5 + $0x36c] sm:$0xf0] }
  0x42   :  { %506 = vmatpush.bf16.msrb.mxu0 %v1246_v40  ;;  %v1546_v40 = vor.u32 %v1808_v37, %v1545_v36  ;;  %v1486_v14 = vor.u32 %v1790_v9, %v1483_v13  ;;  %v1796_v23 = vld [vmem:[#allocation5 + $0x24c] sm:$0xf0]  ;;  %v1786_v24 = vld [vmem:[#allocation5 + $0x204] sm:$0xf]  ;;  %v1587_v28 = vld [vmem:[#allocation5 + $0x2f8] sm:$0xf0] }
  0x43   :  { %532 = vmatpush.bf16.msrb.mxu2 %v1250_v41  ;;  %v1515_v41 = vld [vmem:[#allocation5 + $0x270] sm:$0xf0]  ;;  %v1828_v34 = vld [vmem:[#allocation5 + $0x34c] sm:$0xf0]  ;;  %v1571_v45 = vld [vmem:[#allocation5 + $0x2d8] sm:$0xf0] }
  0x44   :  { %545 = vmatpush.bf16.msrb.mxu3 %v1378_v43  ;;  %519 = vmatpush.bf16.msrb.mxu1 %v1374_v47  ;;  %v1518_v43 = vor.u32 %v1798_v38, %v1515_v41  ;;  %v1481_v41 = vld [vmem:[#allocation5 + $0x220] sm:$0xf]  ;;  %v1713_v13 = vld [vmem:[#allocation5 + $0x3e8] sm:$0xf]  ;;  %s1192_s7 = sshll.u32 %s2112_s4, 4  ;;  %s1193_s7 = int_to_ptr.hbm [resolvable:$true] %s1192_s7 }
  0x46   :  { %507 = vmatpush.bf16.msrb.mxu0 %v1230_v54  ;;  %v1678_v54 = vor.u32 %v1838_v46, %v1675_v51  ;;  %v1609_v46 = vld [vmem:[#allocation5 + $0x320] sm:$0xf] }
  0x47   :  { %533 = vmatpush.bf16.msrb.mxu2 %v1234_v55  ;;  %v1529_v55 = vld [vmem:[#allocation5 + $0x280] sm:$0xf] }
  0x48   :  { %546 = vmatpush.bf16.msrb.mxu3 %v1362_v57  ;;  %520 = vmatpush.bf16.msrb.mxu1 %v1358_v61  ;;  %v1794_v57 = vld [vmem:[#allocation5 + $0x244] sm:$0xf]  ;;  %v1530_v58 = vor.u32 %v1804_v56, %v1529_v55 }
  0x49   :  { %v1502_v62 = vor.u32 %v1794_v57, %v1499_v59  ;;  %v1788_v59 = vld [vmem:[#allocation5 + $0x20c] sm:$0xf0] }
  0x4a   :  { %508 = vmatpush.bf16.msrb.mxu0 %v1214_v2 }
  0x4b   :  { %534 = vmatpush.bf16.msrb.mxu2 %v1218_v3  ;;  %v1658_v3 = vor.u32 %v1836_v0, %v1657_v63  ;;  %v1807_v63 = vld [vmem:[#allocation5 + $0x2ac] sm:$0xf] }
  0x4c   :  { %547 = vmatpush.bf16.msrb.mxu3 %v1346_v4  ;;  %521 = vmatpush.bf16.msrb.mxu1 %v1342_v5  ;;  %v1834_v4 = vld [vmem:[#allocation5 + $0x384] sm:$0xf]  ;;  %v1659_v5 = vld [vmem:[#allocation5 + $0x390] sm:$0xf0] }
  0x4d   :  { %509 = vmatmul.bf16.vlgmr.msrb.gmra.mxu0 %v2004_v49  ;;  %v1662_v6 = vor.u32 %v1834_v4, %v1659_v5 }
  0x4e   :  { %535 = vmatmul.bf16.vlgmr.msrb.gmra.mxu2 %v2004_v49  ;;  %v1848_v49 = vld [vmem:[#allocation5 + $0x3ec] sm:$0xf0]  ;;  %1014 = vmatpush.bf16.msra.mxu0 %v1578_v15  ;;  %v1641_v15 = vld [vmem:[#allocation5 + $0x360] sm:$0xf] }
  0x4f   :  { %548 = vmatmul.bf16.vlgmr.msrb.gmra.mxu3 %v2006_v53  ;;  %522 = vmatmul.bf16.vlgmr.msrb.gmra.mxu1 %v2006_v53  ;;  %v2019_v53 = vld [vmem:[%s2111_s3] sm:$0xf]  ;;  %v1706_v20 = vor.u32 %v1848_v49, %v1705_v18  ;;  %v1642_v19 = vor.u32 %v1832_v16, %v1641_v15 }
  0x50   :  { %1040 = vmatpush.bf16.msra.mxu2 %v1582_v8  ;;  %v121_v26 = vperm.slane %v2019_v53, 0  ;;  %1053 = vmatpush.bf16.msra.mxu3 %v1710_v22  ;;  %v122_v47 = vperm.slane %v2019_v53, 1  ;;  %v1800_v8 = vld [vmem:[#allocation5 + $0x26c] sm:$0xf0]  ;;  %v1497_v22 = vld [vmem:[#allocation5 + $0x240] sm:$0xf] }
  0x51   :  { %1027 = vmatpush.bf16.msra.mxu1 %v1706_v20  ;;  %v1514_v12 = vor.u32 %v1800_v8, %v1513_v7  ;;  %v1643_v20 = vld [vmem:[#allocation5 + $0x370] sm:$0xf0]  ;;  %v1498_v25 = vor.u32 %v1796_v23, %v1497_v22  ;;  %v123_v0 = vperm.slane %v2019_v53, 2  ;;  %v1820_v7 = vld [vmem:[#allocation5 + $0x30c] sm:$0xf0] }
  0x52   :  { %1015 = vmatpush.bf16.msra.mxu0 %v1562_v27  ;;  %v1815_v27 = vld [vmem:[#allocation5 + $0x2ec] sm:$0xf]  ;;  %v1818_v8 = vld [vmem:[#allocation5 + $0x304] sm:$0xf]  ;;  %v1715_v22 = vld [vmem:[#allocation5 + $0x3f8] sm:$0xf0] }
  0x53   :  { %v1590_v32 = vor.u32 %v1815_v27, %v1587_v28  ;;  %v1569_v23 = vld [vmem:[#allocation5 + $0x2c8] sm:$0xf]  ;;  %v1539_v27 = vld [vmem:[#allocation5 + $0x298] sm:$0xf0] }
  0x54   :  { %1041 = vmatpush.bf16.msra.mxu2 %v1566_v11  ;;  %1054 = vmatpush.bf16.msra.mxu3 %v1694_v35  ;;  %v1826_v35 = vld [vmem:[#allocation5 + $0x344] sm:$0xf] }
  0x55   :  { %1028 = vmatpush.bf16.msra.mxu1 %v1690_v33  ;;  %v1625_v33 = vld [vmem:[#allocation5 + $0x340] sm:$0xf] }
  0x56   :  { %1016 = vmatpush.bf16.msra.mxu0 %v1546_v40  ;;  %v1626_v38 = vor.u32 %v1828_v34, %v1625_v33  ;;  %v1845_v33 = vld [vmem:[#allocation5 + $0x3d4] sm:$0xf0]  ;;  %v1843_v34 = vld [vmem:[#allocation5 + $0x3cc] sm:$0xf] }
  0x58   :  { %1042 = vmatpush.bf16.msra.mxu2 %v1550_v17  ;;  %1055 = vmatpush.bf16.msra.mxu3 %v1678_v54  ;;  %v1830_v17 = vld [vmem:[#allocation5 + $0x364] sm:$0xf]  ;;  %v1611_v54 = vld [vmem:[#allocation5 + $0x330] sm:$0xf0] }
  0x59   :  { %1029 = vmatpush.bf16.msra.mxu1 %v1674_v50  ;;  %v1646_v21 = vor.u32 %v1830_v17, %v1643_v20  ;;  %v1849_v17 = vld [vmem:[#allocation5 + $0x3f4] sm:$0xf0] }
  0x5a   :  { %1017 = vmatpush.bf16.msra.mxu0 %v1530_v58  ;;  %v1465_v58 = vld [vmem:[#allocation5 + $0x200] sm:$0xf]  ;;  %v1833_v20 = vld [vmem:[#allocation5 + $0x374] sm:$0xf0] }
  0x5c   :  { %1043 = vmatpush.bf16.msra.mxu2 %v1534_v29  ;;  %1056 = vmatpush.bf16.msra.mxu3 %v1662_v6  ;;  %v1593_v6 = vld [vmem:[#allocation5 + $0x300] sm:$0xf] }
  0x5d   :  { %1030 = vmatpush.bf16.msra.mxu1 %v1658_v3  ;;  %v1594_v15 = vor.u32 %v1820_v7, %v1593_v6 }
  0x5e   :  { %1018 = vmatpush.bf16.msra.mxu0 %v1514_v12  ;;  %v1595_v12 = vld [vmem:[#allocation5 + $0x310] sm:$0xf0] }
  0x5f   :  { %v1598_v16 = vor.u32 %v1818_v8, %v1595_v12  ;;  %v1507_v8 = vld [vmem:[#allocation5 + $0x258] sm:$0xf0]  ;;  %v1837_v12 = vld [vmem:[#allocation5 + $0x394] sm:$0xf0] }
  0x60   :  { %1044 = vmatpush.bf16.msra.mxu2 %v1518_v43  ;;  %1057 = vmatpush.bf16.msra.mxu3 %v1646_v21  ;;  %v1811_v43 = vld [vmem:[#allocation5 + $0x2cc] sm:$0xf]  ;;  %v1714_v21 = vor.u32 %v1849_v17, %v1713_v13  ;;  %v1667_v17 = vld [vmem:[#allocation5 + $0x398] sm:$0xf0] }
  0x61   :  { %1031 = vmatpush.bf16.msra.mxu1 %v1642_v19  ;;  %v1574_v50 = vor.u32 %v1811_v43, %v1571_v45 }
  0x62   :  { %1019 = vmatpush.bf16.msra.mxu0 %v1498_v25  ;;  %v1813_v25 = vld [vmem:[#allocation5 + $0x2d4] sm:$0xf0] }
  0x64   :  { %1045 = vmatpush.bf16.msra.mxu2 %v1502_v62  ;;  %v1817_v62 = vld [vmem:[#allocation5 + $0x2f4] sm:$0xf0] }
  0x65   :  { %1032 = vmatpush.bf16.msra.mxu1 %v1626_v38 }
  0x68   :  { %1046 = vmatpush.bf16.msra.mxu2 %v1486_v14 }
  0xaa   :  { %v458_v39 = vpop.f32.mrf.mxu0 }
  0xab   :  { %v459_v42 = vadd.f32 %v458_v39, %v121_v26  ;;  %v1467_v26 = vld [vmem:[#allocation5 + $0x210] sm:$0xf0] }
  0xac   :  { %v1470_v31 = vor.u32 %v1786_v24, %v1467_v26  ;;  %v1627_v39 = vld [vmem:[#allocation5 + $0x350] sm:$0xf0]  ;;  %v1803_v26 = vld [vmem:[#allocation5 + $0x28c] sm:$0xf] }
  0xad   :  { %v1630_v40 = vor.u32 %v1826_v35, %v1627_v39  ;;  %v1699_v39 = vld [vmem:[#allocation5 + $0x3d8] sm:$0xf0] }
  0xae   :  { %v471_v48 = vpop.f32.mrf.mxu1  ;;  %1047 = vmatpush.bf16.msra.mxu2 %v1470_v31  ;;  %v1542_v31 = vor.u32 %v1803_v26, %v1539_v27 }
  0xaf   :  { %v472_v52 = vadd.f32 %v471_v48, %v459_v42  ;;  %v1792_v42 = vld [vmem:[#allocation5 + $0x22c] sm:$0xf0]  ;;  %1058 = vmatpush.bf16.msra.mxu3 %v1630_v40  ;;  %v50_v40 = vld [vmem:[#allocation2 + $0x8] sm:$0x7] }
  0xb0   :  { %v1482_v44 = vor.u32 %v1792_v42, %v1481_v41  ;;  %v1553_v41 = vld [vmem:[#allocation5 + $0x2a8] sm:$0xf] }
  0xb1   :  { %v484_v60 = vpop.f32.mrf.mxu2  ;;  %v1459_v61 = vmul.f32 -1.442695, %v472_v52  ;;  %v1822_v52 = vld [vmem:[#allocation5 + $0x324] sm:$0xf] }
  0xb2   :  { %v485_v1 = vadd.f32 %v484_v60, %v122_v47  ;;  %v497_v2 = vpop.f32.mrf.mxu3  ;;  %v460_v11 = vpop.f32.mrf.mxu0  ;;  %1092 = vmatpush.bf16.msrb.mxu2 %v1590_v32  ;;  %v1824_v47 = vld [vmem:[#allocation5 + $0x32c] sm:$0xf0]  ;;  %1020 = vmatpush.bf16.msra.mxu0 %v1482_v44  ;;  %v1614_v57 = vor.u32 %v1822_v52, %v1611_v54  ;;  %v1466_v60 = vor.u32 %v1788_v59, %v1465_v58  ;;  %v1697_v32 = vld [vmem:[#allocation5 + $0x3c8] sm:$0xf] }
  0xb3   :  { %1855 = vpow2.f32 %v1459_v61  ;;  %v1610_v51 = vor.u32 %v1824_v47, %v1609_v46  ;;  %v1585_v61 = vld [vmem:[#allocation5 + $0x2e8] sm:$0xf]  ;;  %v124_v11 = vperm.slane %v2019_v53, 3  ;;  %v1698_v38 = vor.u32 %v1845_v33, %v1697_v32  ;;  %v1809_v47 = vld [vmem:[#allocation5 + $0x2b4] sm:$0xf0] }
  0xb4   :  { %v498_v10 = vadd.f32 %v497_v2, %v485_v1  ;;  %1059 = vmatpush.bf16.msra.mxu3 %v1614_v57  ;;  %v1555_v2 = vld [vmem:[#allocation5 + $0x2b8] sm:$0xf0]  ;;  %v1586_v4 = vor.u32 %v1817_v62, %v1585_v61  ;;  %v1702_v46 = vor.u32 %v1843_v34, %v1699_v39  ;;  %v2075_v54 = vpack.c.bf16 %v50_v40, %v50_v40  ;;  %v1681_v58 = vld [vmem:[#allocation5 + $0x3a8] sm:$0xf]  ;;  %v1841_v61 = vld [vmem:[#allocation5 + $0x3b4] sm:$0xf0] }
  0xb5   :  { %1033 = vmatpush.bf16.msra.mxu1 %v1610_v51  ;;  %v1558_v5 = vor.u32 %v1807_v63, %v1555_v2  ;;  %v1523_v57 = vld [vmem:[#allocation5 + $0x278] sm:$0xf0]  ;;  %v1839_v62 = vld [vmem:[#allocation5 + $0x3ac] sm:$0xf]  ;;  %v1805_v2 = vld [vmem:[#allocation5 + $0x294] sm:$0xf0] }
  0xb6   :  { %v1460_v18 = vmul.f32 -1.442695, %v498_v10  ;;  %v473_v49 = vpop.f32.mrf.mxu1  ;;  %1093 = vmatpush.bf16.msrb.mxu2 %v1574_v50  ;;  %1021 = vmatpush.bf16.msra.mxu0 %v1466_v60  ;;  %v49_v53 = vld [vmem:[#allocation2 + $0x4] sm:$0x7]  ;;  %v1649_v33 = vld [vmem:[#allocation5 + $0x368] sm:$0xf] }
  0xb7   :  { %1048 = vmatmul.bf16.vlgmr.msra.gmra.mxu2 %v2075_v54 }
  0xb8   :  { %1857 = vpow2.f32 %v1460_v18  ;;  %v1847_v18 = vld [vmem:[#allocation5 + $0x3ec] sm:$0xf]  ;;  %1060 = vmatpush.bf16.msra.mxu3 %v1598_v16 }
  0xb9   :  { %v1856_v29 = vpop.eup %1855  ;;  %v486_v30 = vpop.f32.mrf.mxu2  ;;  %1034 = vmatpush.bf16.msra.mxu1 %v1594_v15  ;;  %v1718_v24 = vor.u32 %v1847_v18, %v1715_v22  ;;  %v1835_v16 = vld [vmem:[#allocation5 + $0x38c] sm:$0xf]  ;;  %1022 = vmatmul.bf16.vlgmr.msra.gmra.mxu0 %v2075_v54  ;;  %v1521_v18 = vld [vmem:[#allocation5 + $0x268] sm:$0xf] }
  0xba   :  { %v2023_v36 = vadd.f32 1.0, %v1856_v29  ;;  %v499_v37 = vpop.f32.mrf.mxu3  ;;  %1066 = vmatpush.bf16.msrb.mxu0 %v1586_v4  ;;  %1094 = vmatpush.bf16.msrb.mxu2 %v1558_v5  ;;  %v1570_v30 = vor.u32 %v1813_v25, %v1569_v23  ;;  %v1795_v4 = vld [vmem:[#allocation5 + $0x24c] sm:$0xf]  ;;  %v1491_v23 = vld [vmem:[#allocation5 + $0x238] sm:$0xf0]  ;;  %v1670_v27 = vor.u32 %v1835_v16, %v1667_v17 }
  0xbb   :  { %v1510_v15 = vor.u32 %v1795_v4, %v1507_v8  ;;  %v1791_v22 = vld [vmem:[#allocation5 + $0x22c] sm:$0xf]  ;;  %v1601_v8 = vld [vmem:[#allocation5 + $0x308] sm:$0xf] }
  0xbc   :  { %1859 = vrcp.f32 %v2023_v36  ;;  %v568_v56 = vand.u32 2147483648, %v2023_v36  ;;  %v566_v1 = vand.u32 2147483647, %v2023_v36  ;;  %vm562_vm1 = vweird.f32 %v2023_v36  ;;  %1105 = vmatpush.bf16.msrb.mxu3 %v1718_v24 }
  0xbd   :  { %1079 = vmatpush.bf16.msrb.mxu1 %v1714_v21  ;;  %v1801_v21 = vld [vmem:[#allocation5 + $0x274] sm:$0xf0] }
  0xbe   :  { %v1858_v48 = vpop.eup %1857  ;;  %v2036_v10 = vor.u32 1.1754944e-38, %v568_v56  ;;  %vm2041_vm0 = vcmp.eq.f32.partialorder %v566_v1, 8.507059e+37  ;;  %1067 = vmatpush.bf16.msrb.mxu0 %v1570_v30  ;;  %1095 = vmatpush.bf16.msrb.mxu2 %v1542_v31  ;;  %v1554_v56 = vor.u32 %v1809_v47, %v1553_v41  ;;  %v1537_v1 = vld [vmem:[#allocation5 + $0x288] sm:$0xf]  ;;  %v1494_v31 = vor.u32 %v1791_v22, %v1491_v23 }
  0xbf   :  { %v2026_v55 = vadd.f32 1.0, %v1858_v48  ;;  %v1799_v48 = vld [vmem:[#allocation5 + $0x26c] sm:$0xf]  ;;  %v1538_v7 = vor.u32 %v1805_v2, %v1537_v1  ;;  %v1633_v47 = vld [vmem:[#allocation5 + $0x348] sm:$0xf] }
  0xc0   :  { %v1526_v60 = vor.u32 %v1799_v48, %v1523_v57  ;;  %1106 = vmatpush.bf16.msrb.mxu3 %v1702_v46  ;;  %v1829_v48 = vld [vmem:[#allocation5 + $0x354] sm:$0xf0]  ;;  %v1473_v1 = vld [vmem:[#allocation5 + $0x208] sm:$0xf] }
  0xc1   :  { %1861 = vrcp.f32 %v2026_v55  ;;  %v585_v14 = vand.u32 2147483647, %v2026_v55  ;;  %v587_v49 = vand.u32 2147483648, %v2026_v55  ;;  %vm581_vm3 = vweird.f32 %v2026_v55  ;;  %1080 = vmatpush.bf16.msrb.mxu1 %v1698_v38  ;;  %v1505_v38 = vld [vmem:[#allocation5 + $0x248] sm:$0xf] }
  0xc2   :  { %v2032_v3 = vpop.eup %1859  ;;  %1068 = vmatpush.bf16.msrb.mxu0 %v1554_v56  ;;  %1096 = vmatpush.bf16.msrb.mxu2 %v1526_v60  ;;  %v1489_v56 = vld [vmem:[#allocation5 + $0x228] sm:$0xf]  ;;  %v1793_v57 = vld [vmem:[#allocation5 + $0x234] sm:$0xf0] }
  0xc3   :  { %v558_v9 = vmul.f32 %v2032_v3, %v2023_v36  ;;  %vm563_vm2 = vweird.f32 %v2032_v3  ;;  %v588_v42 = vor.u32 1.1754944e-38, %v587_v49  ;;  %vm2071_vm7 = vcmp.eq.f32.partialorder %v585_v14, 8.507059e+37  ;;  %v1635_v36 = vld [vmem:[#allocation5 + $0x358] sm:$0xf0]  ;;  %v1789_v2 = vld [vmem:[#allocation5 + $0x214] sm:$0xf0] }
  0xc4   :  { %vm2059_vm5 = vmor %vm562_vm1, %vm563_vm2 }
  0xc5   :  { %v559_v19 = vsub.f32 1.0, %v558_v9  ;;  %v1665_v9 = vld [vmem:[#allocation5 + $0x388] sm:$0xf] }
  0xc6   :  { %1069 = vmatpush.bf16.msrb.mxu0 %v1538_v7  ;;  %1097 = vmatpush.bf16.msrb.mxu2 %v1510_v15 }
  0xc7   :  { %v2047_v28 = vpop.eup %1861  ;;  %v560_v29 = vmul.f32 %v2032_v3, %v559_v19  ;;  %v1666_v19 = vor.u32 %v1837_v12, %v1665_v9  ;;  %v1821_v9 = vld [vmem:[#allocation5 + $0x314] sm:$0xf0]  ;;  %v1474_v12 = vor.u32 %v1789_v2, %v1473_v1 }
  0xc8   :  { %v577_v35 = vmul.f32 %v2047_v28, %v2026_v55  ;;  %vm582_vm4 = vweird.f32 %v2047_v28  ;;  %v1683_v55 = vld [vmem:[#allocation5 + $0x3b8] sm:$0xf0]  ;;  %v1602_v15 = vor.u32 %v1821_v9, %v1601_v8 }
  0xc9   :  { %v561_v44 = vadd.f32 %v2032_v3, %v560_v29  ;;  %vm2067_vm6 = vmor %vm581_vm3, %vm582_vm4  ;;  %v1686_v6 = vor.u32 %v1839_v62, %v1683_v55  ;;  %v1522_v29 = vor.u32 %v1801_v21, %v1521_v18  ;;  %v1825_v62 = vld [vmem:[#allocation5 + $0x334] sm:$0xf0]  ;;  %v1490_v55 = vor.u32 %v1793_v57, %v1489_v56 }
  0xca   :  { %v510_v37 = vpop.f32.mrf.mxu0  ;;  %v578_v50 = vsub.f32 1.0, %v577_v35  ;;  %1098 = vmatpush.bf16.msrb.mxu2 %v1494_v31 }
  0xcb   :  { %v511_v43 = vadd.f32 %v510_v37, %v123_v0  ;;  %v1682_v0 = vor.u32 %v1841_v61, %v1681_v58  ;;  %v565_v5 = vsel %vm2059_vm5, %v2032_v3, %v561_v44  ;;  %1107 = vmatpush.bf16.msrb.mxu3 %v1686_v6  ;;  %v1651_v37 = vld [vmem:[#allocation5 + $0x378] sm:$0xf0]  ;;  %1070 = vmatpush.bf16.msrb.mxu0 %v1522_v29  ;;  %v1617_v61 = vld [vmem:[#allocation5 + $0x328] sm:$0xf] }
  0xcc   :  { %v523_v52 = vpop.f32.mrf.mxu1  ;;  %v579_v63 = vmul.f32 %v2047_v28, %v578_v50  ;;  %v570_v24 = vsel %vm2041_vm0, %v2036_v10, %v565_v5  ;;  %v1831_v10 = vld [vmem:[#allocation5 + $0x36c] sm:$0xf]  ;;  %v1475_v44 = vld [vmem:[#allocation5 + $0x218] sm:$0xf0]  ;;  %v1618_v5 = vor.u32 %v1825_v62, %v1617_v61 }
  0xcd   :  { %v524_v59 = vadd.f32 %v523_v52, %v511_v43  ;;  %1081 = vmatpush.bf16.msrb.mxu1 %v1682_v0  ;;  %v1654_v41 = vor.u32 %v1831_v10, %v1651_v37  ;;  %v1797_v43 = vld [vmem:[#allocation5 + $0x254] sm:$0xf0]  ;;  %v1827_v50 = vld [vmem:[#allocation5 + $0x34c] sm:$0xf]  ;;  %v1619_v0 = vld [vmem:[#allocation5 + $0x338] sm:$0xf0] }
  0xce   :  { %v580_v13 = vadd.f32 %v2047_v28, %v579_v63  ;;  %v1506_v45 = vor.u32 %v1797_v43, %v1505_v38  ;;  %v1638_v60 = vor.u32 %v1827_v50, %v1635_v36  ;;  %v1823_v63 = vld [vmem:[#allocation5 + $0x32c] sm:$0xf] }
  0xcf   :  { %1863 = vtanh.f32 %v524_v59  ;;  %1108 = vmatpush.bf16.msrb.mxu3 %v1670_v27  ;;  %v1634_v59 = vor.u32 %v1829_v48, %v1633_v47  ;;  %v1622_v7 = vor.u32 %v1823_v63, %v1619_v0 }
  0xd0   :  { %v584_v25 = vsel %vm2067_vm6, %v2047_v28, %v580_v13  ;;  %v1650_v28 = vor.u32 %v1833_v20, %v1649_v33  ;;  %1071 = vmatpush.bf16.msrb.mxu0 %v1506_v45  ;;  %v1819_v13 = vld [vmem:[#allocation5 + $0x30c] sm:$0xf]  ;;  %v1462_v33 = vld [vmem:[%s2111_s3 + $0x4] sm:$0xf]  ;;  %s1969_s3 = smov [#allocation7]  }
  0xd1   :  { %v536_v14 = vpop.f32.mrf.mxu2  ;;  %1082 = vmatpush.bf16.msrb.mxu1 %v1666_v19  ;;  %v686_v10 = vperm.slane %v1462_v33, 0  ;;  %v689_v48 = vperm.slane %v1462_v33, 3  ;;  %v688_v36 = vperm.slane %v1462_v33, 2  ;;  %s1190_s30 = sshll.u32 %s1969_s3, 4  ;;  %s1191_s30 = int_to_ptr.vmem [resolvable:$true] %s1190_s30 }
  0xd2   :  { %v537_v3 = vadd.f32 %v536_v14, %v124_v11  ;;  %v549_v49 = vpop.f32.mrf.mxu3  ;;  %v512_v26 = vpop.f32.mrf.mxu0  ;;  %v589_v11 = vsel %vm2071_vm7, %v588_v42, %v584_v25  ;;  %v1787_v42 = vld [vmem:[#allocation5 + $0x20c] sm:$0xf]  ;;  %v1603_v14 = vld [vmem:[#allocation5 + $0x318] sm:$0xf0] }
  0xd3   :  { %v611_v39 = vmul.f32 %v589_v11, %v49_v53  ;;  %v1478_v46 = vor.u32 %v1787_v42, %v1475_v44  ;;  %1109 = vmatpush.bf16.msrb.mxu3 %v1654_v41  ;;  %v1606_v16 = vor.u32 %v1819_v13, %v1603_v14 }
  0xd4   :  { %v550_v30 = vadd.f32 %v549_v49, %v537_v3  ;;  %v525_v32 = vpop.f32.mrf.mxu1  ;;  %1072 = vmatpush.bf16.msrb.mxu0 %v1490_v55 }
  0xd5   :  { %v1864_v34 = vpop.eup %1863  ;;  %1083 = vmatpush.bf16.msrb.mxu1 %v1650_v28  ;;  %1099 = vmatpush.bf16.msrb.mxu2 %v1478_v46  ;;  %v687_v28 = vperm.slane %v1462_v33, 1 }
  0xd6   :  { %v1461_v35 = vmul.f32 -1.442695, %v550_v30  ;;  %v612_v40 = vmul.f32 %v1864_v34, %v570_v24 }
  0xd7   :  { %1110 = vmatpush.bf16.msrb.mxu3 %v1638_v60 }
  0xd8   :  { %1865 = vpow2.f32 %v1461_v35  ;;  %v613_v51 = vadd.f32 %v612_v40, %v611_v39  ;;  %1100 = vmatmul.bf16.vlgmr.msrb.gmra.mxu2 %v2075_v54  ;;  %1073 = vmatpush.bf16.msrb.mxu0 %v1474_v12 }
  0xd9   :  { %v538_v52 = vpop.f32.mrf.mxu2  ;;  %1084 = vmatpush.bf16.msrb.mxu1 %v1634_v59 }
  0xda   :  { %v551_v58 = vpop.f32.mrf.mxu3  ;;  %1182 = vst [vmem:[#allocation7 + $0x4] sm:$0x7] %v613_v51 }
  0xdb   :  { %1111 = vmatpush.bf16.msrb.mxu3 %v1622_v7  ;;  %1074 = vmatmul.bf16.vlgmr.msrb.gmra.mxu0 %v2075_v54 }
  0xdd   :  { %1085 = vmatpush.bf16.msrb.mxu1 %v1618_v5 }
  0xde   :  { %v1866_v4 = vpop.eup %1865 }
  0xdf   :  { %v595_v6 = vadd.f32 1.0, %v1866_v4  ;;  %1112 = vmatpush.bf16.msrb.mxu3 %v1606_v16 }
  0xe1   :  { %1867 = vrcp.f32 %v595_v6  ;;  %1086 = vmatpush.bf16.msrb.mxu1 %v1602_v15  ;;  %v607_v49 = vand.u32 2147483648, %v595_v6  ;;  %v605_v21 = vand.u32 2147483647, %v595_v6  ;;  %vm601_vm9 = vweird.f32 %v595_v6 }
  0xe2   :  { %1869 = vtanh.f32 %v613_v51 }
  0xe3   :  { %v608_v23 = vor.u32 1.1754944e-38, %v607_v49  ;;  %vm606_vm11 = vcmp.eq.f32.partialorder %v605_v21, 8.507059e+37 }
  0xe7   :  { %v1868_v17 = vpop.eup %1867 }
  0xe8   :  { %v597_v18 = vmul.f32 %v1868_v17, %v595_v6  ;;  %vm602_vm8 = vweird.f32 %v1868_v17  ;;  %v1870_v25 = vpop.eup %1869 }
  0xe9   :  { %vm603_vm10 = vmor %vm601_vm9, %vm602_vm8 }
  0xea   :  { %v598_v3 = vsub.f32 1.0, %v597_v18 }
  0xec   :  { %v599_v19 = vmul.f32 %v1868_v17, %v598_v3 }
  0xee   :  { %v600_v22 = vadd.f32 %v1868_v17, %v599_v19  ;;  %v51_v19 = vld [vmem:[#allocation2 + $0xc] sm:$0x7] }
  0xf0   :  { %v604_v24 = vsel %vm603_vm10, %v1868_v17, %v600_v22 }
  0xf1   :  { %v609_v26 = vsel %vm606_vm11, %v608_v23, %v604_v24 }
  0xf2   :  { %v615_v27 = vmul.f32 %v1870_v25, %v609_v26 }
  0xf4   :  { %v617_v29 = vpack.c.bf16 %v615_v27, %v615_v27  ;;  %1181 = vst [vmem:[#allocation7] sm:$0x7] %v615_v27 }
  0xf6   :  { %1035 = vmatmul.bf16.vlgmr.msra.gmra.mxu1 %v617_v29  ;;  %1061 = vmatmul.bf16.vlgmr.msra.gmra.mxu3 %v617_v29 }
 0x106   :  { %1087 = vmatmul.bf16.vlgmr.msrb.gmra.mxu1 %v617_v29  ;;  %1113 = vmatmul.bf16.vlgmr.msrb.gmra.mxu3 %v617_v29 }
 0x136   :  { %v1023_v54 = vpop.f32.mrf.mxu0 }
 0x137   :  { %v1024_v35 = vadd.f32 %v1023_v54, %v686_v10 }
 0x13a   :  { %v1049_v53 = vpop.f32.mrf.mxu2 }
 0x13b   :  { %v1050_v39 = vadd.f32 %v1049_v53, %v687_v28 }
 0x13e   :  { %v1025_v11 = vpop.f32.mrf.mxu0 }
 0x142   :  { %v1051_v30 = vpop.f32.mrf.mxu2 }
 0x158   :  { %v1075_v32 = vpop.f32.mrf.mxu0 }
 0x159   :  { %v1076_v59 = vadd.f32 %v1075_v32, %v688_v36 }
 0x15b   :  { %v1101_v31 = vpop.f32.mrf.mxu2 }
 0x15c   :  { %v1102_v56 = vadd.f32 %v1101_v31, %v689_v48 }
 0x160   :  { %v1077_v34 = vpop.f32.mrf.mxu0 }
 0x163   :  { %v1103_v20 = vpop.f32.mrf.mxu2 }
 0x173   :  { %v1036_v37 = vpop.f32.mrf.mxu1 }
 0x174   :  { %v1037_v38 = vadd.f32 %v1036_v37, %v1024_v35 }
 0x176   :  { %v1719_v40 = vmul.f32 -1.442695, %v1037_v38 }
 0x178   :  { %1871 = vpow2.f32 %v1719_v40 }
 0x179   :  { %v1062_v41 = vpop.f32.mrf.mxu3 }
 0x17a   :  { %v1063_v43 = vadd.f32 %v1062_v41, %v1050_v39 }
 0x17b   :  { %v1038_v42 = vpop.f32.mrf.mxu1 }
 0x17c   :  { %v1720_v44 = vmul.f32 -1.442695, %v1063_v43 }
 0x17e   :  { %v1872_v45 = vpop.eup %1871  ;;  %1873 = vpow2.f32 %v1720_v44 }
 0x17f   :  { %v1121_v46 = vadd.f32 1.0, %v1872_v45 }
 0x181   :  { %1875 = vrcp.f32 %v1121_v46  ;;  %v1064_v47 = vpop.f32.mrf.mxu3  ;;  %v1133_v6 = vand.u32 2147483648, %v1121_v46  ;;  %vm1127_vm13 = vweird.f32 %v1121_v46  ;;  %v1131_v8 = vand.u32 2147483647, %v1121_v46 }
 0x183   :  { %v1088_v50 = vpop.f32.mrf.mxu1  ;;  %v1134_v17 = vor.u32 1.1754944e-38, %v1133_v6  ;;  %vm1132_vm1 = vcmp.eq.f32.partialorder %v1131_v8, 8.507059e+37 }
 0x184   :  { %v1874_v51 = vpop.eup %1873  ;;  %v1089_v2 = vadd.f32 %v1088_v50, %v1076_v59 }
 0x185   :  { %v1140_v52 = vadd.f32 1.0, %v1874_v51 }
 0x187   :  { %v1876_v57 = vpop.eup %1875  ;;  %1877 = vrcp.f32 %v1140_v52  ;;  %v1152_v9 = vand.u32 2147483648, %v1140_v52  ;;  %v1150_v16 = vand.u32 2147483647, %v1140_v52  ;;  %vm1146_vm0 = vweird.f32 %v1140_v52 }
 0x188   :  { %v1123_v58 = vmul.f32 %v1876_v57, %v1121_v46  ;;  %vm1128_vm12 = vweird.f32 %v1876_v57 }
 0x189   :  { %v1114_v60 = vpop.f32.mrf.mxu3  ;;  %vm2099_vm14 = vmor %vm1127_vm13, %vm1128_vm12  ;;  %v1153_v49 = vor.u32 1.1754944e-38, %v1152_v9  ;;  %vm1151_vm3 = vcmp.eq.f32.partialorder %v1150_v16, 8.507059e+37 }
 0x18a   :  { %v1124_v61 = vsub.f32 1.0, %v1123_v58  ;;  %v1115_v62 = vadd.f32 %v1114_v60, %v1102_v56 }
 0x18b   :  { %v1090_v55 = vpop.f32.mrf.mxu1 }
 0x18c   :  { %v1125_v63 = vmul.f32 %v1876_v57, %v1124_v61  ;;  %v1721_v0 = vmul.f32 -1.442695, %v1115_v62 }
 0x18d   :  { %v1878_v1 = vpop.eup %1877 }
 0x18e   :  { %v1142_v4 = vmul.f32 %v1878_v1, %v1140_v52  ;;  %v1126_v5 = vadd.f32 %v1876_v57, %v1125_v63  ;;  %1879 = vpow2.f32 %v1721_v0  ;;  %vm1147_vm15 = vweird.f32 %v1878_v1 }
 0x18f   :  { %1881 = vtanh.f32 %v1089_v2  ;;  %vm1148_vm2 = vmor %vm1146_vm0, %vm1147_vm15 }
 0x190   :  { %v1143_v7 = vsub.f32 1.0, %v1142_v4  ;;  %v1130_v15 = vsel %vm2099_vm14, %v1876_v57, %v1126_v5 }
 0x191   :  { %v1116_v13 = vpop.f32.mrf.mxu3  ;;  %v1135_v21 = vsel %vm1132_vm1, %v1134_v17, %v1130_v15 }
 0x192   :  { %v1144_v14 = vmul.f32 %v1878_v1, %v1143_v7 }
 0x194   :  { %v1880_v18 = vpop.eup %1879  ;;  %v1145_v3 = vadd.f32 %v1878_v1, %v1144_v14 }
 0x195   :  { %v1160_v22 = vadd.f32 1.0, %v1880_v18  ;;  %v1882_v24 = vpop.eup %1881 }
 0x196   :  { %v1149_v23 = vsel %vm1148_vm2, %v1878_v1, %v1145_v3  ;;  %v1177_v27 = vmul.f32 %v1882_v24, %v1135_v21 }
 0x197   :  { %v1154_v25 = vsel %vm1151_vm3, %v1153_v49, %v1149_v23  ;;  %1883 = vrcp.f32 %v1160_v22  ;;  %v1172_v30 = vand.u32 2147483648, %v1160_v22  ;;  %v1170_v32 = vand.u32 2147483647, %v1160_v22 }
 0x198   :  { %v1176_v26 = vmul.f32 %v1154_v25, %v51_v19  ;;  %vm1166_vm5 = vweird.f32 %v1160_v22 }
 0x199   :  { %v1173_v20 = vor.u32 1.1754944e-38, %v1172_v30  ;;  %vm1171_vm7 = vcmp.eq.f32.partialorder %v1170_v32, 8.507059e+37 }
 0x19a   :  { %v1178_v29 = vadd.f32 %v1177_v27, %v1176_v26 }
 0x19c   :  { %1184 = vst [vmem:[#allocation7 + $0xc] sm:$0x7] %v1178_v29  ;;  %1885 = vtanh.f32 %v1178_v29 }
 0x19d   :  { %v1884_v54 = vpop.eup %1883 }
 0x19e   :  { %v1162_v53 = vmul.f32 %v1884_v54, %v1160_v22  ;;  %vm1167_vm4 = vweird.f32 %v1884_v54 }
 0x19f   :  { %vm1168_vm6 = vmor %vm1166_vm5, %vm1167_vm4 }
 0x1a0   :  { %v1163_v11 = vsub.f32 1.0, %v1162_v53 }
 0x1a2   :  { %v1164_v31 = vmul.f32 %v1884_v54, %v1163_v11  ;;  %v1886_v34 = vpop.eup %1885 }
 0x1a4   :  { %v1165_v33 = vadd.f32 %v1884_v54, %v1164_v31 }
 0x1a6   :  { %v1169_v10 = vsel %vm1168_vm6, %v1884_v54, %v1165_v33 }
 0x1a7   :  { %v1174_v35 = vsel %vm1171_vm7, %v1173_v20, %v1169_v10 }
 0x1a8   :  { %v1180_v28 = vmul.f32 %v1886_v34, %v1174_v35 }
 0x1aa   :  { %1183 = vst [vmem:[#allocation7 + $0x8] sm:$0x7] %v1180_v28 }
 0x1ab   :  { %1195 = dma.vmem_to_hbm [thread:$0]  %s1191_s30, 256, %s1193_s7, [#allocation4]  }
 0x1ac   :  { %1963 = dma.done.wait [#allocation4], 256  }
 0x1ad   :  { %1964 = vsyncadd [#allocation4], 4294967040 }
 0x1ae   :  { %1200 = vsyncpa [#allocation3], 1 }
 0x1af   :  { %1201 = vsyncpa [#allocation6], 1 }
 0x1b0   :  { %1202 = vsyncpa [#allocation4], 1 }

</bundles_post_ra>
